<compile_context>
chip_gen: v7x
topology: tpu7x:2x2x1
jax: 0.10.0
libtpu: 0.0.40
codegen_flags: <defaults>
</compile_context>

<pallas_src>
import math

import jax
import jax.numpy as jnp
from jax import lax
from jax.experimental import pallas as pl
from jax.experimental.pallas import tpu as pltpu


def _round_up(x, m):
    return ((x + m - 1) // m) * m


def _make_recon_loss_kernel(n_rows, K, T, tile_n, mask_rows):
    """Kernel over a (tile_n, T) block of logits in the native (N, T) layout.

    Every group of K consecutive lanes is one class-row of the (N, K, K)
    view; its top-2 is computed with a disjoint prefix-doubling butterfly of
    pltpu.roll steps along the lane axis (no transpose / argmax / one-hot).
    """
    assert K & (K - 1) == 0 and K >= 2

    def kernel(x_ref, out_ref):
        x = x_ref[...].astype(jnp.float32)

        if mask_rows:
            # Only the ragged last tile has out-of-bounds rows.  Selecting
            # them to -inf makes the elementwise term 0 and top1 = -inf kills
            # the label contribution.  MUST stay a select (jnp.where), never
            # arithmetic masking, so NaN/Inf DMA padding cannot leak in.
            row = (lax.broadcasted_iota(jnp.int32, (tile_n, 1), 0)
                   + pl.program_id(0) * tile_n)
            x = jnp.where(row < n_rows, x, -jnp.inf)

        ngrp = tile_n // 8

        # --- elementwise BCE term, reduced early to an (8, T) slab ----------
        elem = jnp.maximum(x, 0.0) + jnp.log1p(jnp.exp(-jnp.abs(x)))
        elem_part = jnp.sum(elem.reshape(ngrp, 8, T), axis=0)

        # --- per-group top-2 via lane butterfly -----------------------------
        # After combining with roll(., s) for s = 1, 2, ..., K/2 the value at
        # lane l covers the DISJOINT lane set {l, l-1, ..., l-K+1}, so the
        # last lane of each K-lane group (l % K == K-1) holds the exact top-2
        # of its group, counted with multiplicity (tie => top2 == top1).
        b = pltpu.roll(x, 1, axis=1)
        m1 = jnp.maximum(x, b)
        m2 = jnp.minimum(x, b)
        s = 2
        while s < K:
            t2 = jnp.maximum(m2, pltpu.roll(m2, s, axis=1))   # old m2 dead here
            r1 = pltpu.roll(m1, s, axis=1)
            new_m1 = jnp.maximum(m1, r1)
            m2 = jnp.maximum(jnp.minimum(m1, r1), t2)
            m1 = new_m1
            s *= 2

        lane = lax.broadcasted_iota(jnp.int32, (1, T), 1)
        group_end = (lane & (K - 1)) == (K - 1)
        # mask == (sigmoid(top1) > 0.5) == (top1 > 0); label elimination:
        #   sum(x * labels) over a group == (top1 > 0) * (top1 + top2).
        contrib = jnp.where(group_end & (m1 > 0.0), m1 + m2, 0.0)
        contrib_part = jnp.sum(contrib.reshape(ngrp, 8, T), axis=0)

        # Lane-dense, unmasked (8, T) vector partial-sum store.
        out_ref[...] = elem_part - contrib_part

    return kernel


def recon_loss(pred_logits, tile_bytes=4 * 1024 * 1024):
    """Scalar f32 ReconLoss for pred_logits of shape (N, T), T = K*K."""
    N, T = pred_logits.shape
    K = int(round(T ** 0.5))
    assert K * K == T, "T must be a perfect square"
    assert K >= 2, "top-2 needs at least 2 classes"
    # TODO(synk): non-power-of-two K needs a binary-decomposed butterfly
    # schedule (disjoint windows); only power-of-two K is implemented here.
    assert K & (K - 1) == 0, "lane-butterfly top-2 assumes power-of-two K"

    # Row tile from an f32-equivalent VMEM budget (HBM block is smaller for
    # bf16 inputs).  Cap so (a) the tile never exceeds the (8-rounded) array
    # and (b) the grid keeps >= 2 tiles when N allows it, so both v7x
    # TensorCores get work under dimension_semantics=("parallel",).
    tile_n = max(8, (tile_bytes // (T * 4)) // 8 * 8)
    if N >= 16:
        tile_n = min(tile_n, _round_up(-(-N // 2), 8))
    tile_n = min(tile_n, _round_up(N, 8))
    num_tiles = -(-N // tile_n)
    mask_rows = (N % tile_n) != 0            # only then is the last tile ragged

    log2k = max(1, int(round(math.log2(K))))
    cost = pl.CostEstimate(
        flops=N * T * (10 + 6 * log2k),
        transcendentals=2 * N * T,
        bytes_accessed=(N * T * pred_logits.dtype.itemsize
                        + num_tiles * 8 * T * 4),
    )

    partials = pl.pallas_call(
        _make_recon_loss_kernel(N, K, T, tile_n, mask_rows),
        out_shape=jax.ShapeDtypeStruct((8 * num_tiles, T), jnp.float32),
        grid=(num_tiles,),
        in_specs=[pl.BlockSpec((tile_n, T), lambda i: (i, 0))],
        out_specs=pl.BlockSpec((8, T), lambda i: (i, 0)),
        compiler_params=pltpu.CompilerParams(
            dimension_semantics=("parallel",),      # megacore-shardable on v7x
            vmem_limit_bytes=40 * 1024 * 1024,
        ),
        cost_estimate=cost,
    )(pred_logits)

    # Tiny cross-tile reduction (single dense sum, no strided slice).
    return jnp.sum(partials)


def _recon_loss_ref(pred_logits):
    # Pure-JAX mirror of the PyTorch module (sanity check only).
    N, T = pred_logits.shape
    K = int(round(T ** 0.5))
    x = pred_logits.reshape(N, K, K).astype(jnp.float32)
    top2_vals, top2_idx = lax.top_k(x, 2)
    onehot = jnp.sum(jax.nn.one_hot(top2_idx, K, dtype=jnp.float32), axis=-2)
    mask = (jax.nn.sigmoid(top2_vals[..., :1]) > 0.5).astype(jnp.float32)
    labels = onehot * mask
    loss = jnp.maximum(x, 0.0) - x * labels + jnp.log1p(jnp.exp(-jnp.abs(x)))
    return jnp.sum(loss)


if __name__ == "__main__":
    key = jax.random.PRNGKey(0)
    N, K = 8, 16
    T = K * K                                       # 256

    pred_logits = jax.random.normal(key, (N, T), dtype=jnp.float32) * 2.0
    loss = recon_loss(pred_logits)
    jax.block_until_ready(loss)
    ref = _recon_loss_ref(pred_logits)
    assert jnp.allclose(loss, ref, rtol=5e-5, atol=1e-3), (loss, ref)

    # Multi-tile grid + ragged last tile (exercises the -inf row masking).
    x2 = jax.random.normal(jax.random.fold_in(key, 1), (20, T),
                           dtype=jnp.float32) * 2.0
    loss2 = recon_loss(x2, tile_bytes=8 * T * 4)    # tile_n = 8 -> 3 tiles
    jax.block_until_ready(loss2)
    ref2 = _recon_loss_ref(x2)
    assert jnp.allclose(loss2, ref2, rtol=5e-5, atol=1e-3), (loss2, ref2)

    print("KERNEL_OK")
</pallas_src>

<mosaic_0001>
module attributes {stable_mosaic.version = 11 : i64} {
  func.func @kernel(%arg0: i32, %arg1: memref<8x256xf32, #tpu.memory_space<vmem>>, %arg2: memref<8x256xf32, #tpu.memory_space<vmem>>) attributes {dimension_semantics = [#tpu.dimension_semantics<parallel>], iteration_bounds = array<i64: 1>, scalar_prefetch = 0 : i64, scratch_operands = 0 : i64, tpu.core_type = #tpu.core_type<tc>, window_params = [{transform_indices = @transform_0, window_bounds = array<i64: 8, 256>}, {transform_indices = @transform_1, window_bounds = array<i64: 8, 256>}]} {
    %c0 = arith.constant 0 : index
    %c0_0 = arith.constant 0 : index
    %0 = vector.load %arg1[%c0, %c0_0] : memref<8x256xf32, #tpu.memory_space<vmem>>, vector<8x256xf32>
    %cst = arith.constant 0.000000e+00 : f32
    %1 = vector.broadcast %cst : f32 to vector<8x256xf32>
    %2 = arith.maximumf %0, %1 : vector<8x256xf32>
    %3 = math.absf %0 : vector<8x256xf32>
    %cst_1 = arith.constant 0.000000e+00 : f32
    %4 = vector.broadcast %cst_1 : f32 to vector<8x256xf32>
    %5 = arith.subf %4, %3 : vector<8x256xf32>
    %6 = math.exp %5 : vector<8x256xf32>
    %7 = math.log1p %6 : vector<8x256xf32>
    %8 = arith.addf %2, %7 : vector<8x256xf32>
    %9 = vector.shape_cast %8 : vector<8x256xf32> to vector<1x8x256xf32>
    %cst_2 = arith.constant dense<0.000000e+00> : vector<8x256xf32>
    %10 = vector.multi_reduction <add>, %9, %cst_2 [0] : vector<1x8x256xf32> to vector<8x256xf32>
    %c1_i32 = arith.constant 1 : i32
    %11 = tpu.dynamic_rotate %0 by %c1_i32 dim 1 : vector<8x256xf32>, i32 -> vector<8x256xf32>
    %12 = arith.maximumf %0, %11 : vector<8x256xf32>
    %13 = arith.minimumf %0, %11 : vector<8x256xf32>
    %c2_i32 = arith.constant 2 : i32
    %14 = tpu.dynamic_rotate %13 by %c2_i32 dim 1 : vector<8x256xf32>, i32 -> vector<8x256xf32>
    %15 = arith.maximumf %13, %14 : vector<8x256xf32>
    %c2_i32_3 = arith.constant 2 : i32
    %16 = tpu.dynamic_rotate %12 by %c2_i32_3 dim 1 : vector<8x256xf32>, i32 -> vector<8x256xf32>
    %17 = arith.maximumf %12, %16 : vector<8x256xf32>
    %18 = arith.minimumf %12, %16 : vector<8x256xf32>
    %19 = arith.maximumf %18, %15 : vector<8x256xf32>
    %c4_i32 = arith.constant 4 : i32
    %20 = tpu.dynamic_rotate %19 by %c4_i32 dim 1 : vector<8x256xf32>, i32 -> vector<8x256xf32>
    %21 = arith.maximumf %19, %20 : vector<8x256xf32>
    %c4_i32_4 = arith.constant 4 : i32
    %22 = tpu.dynamic_rotate %17 by %c4_i32_4 dim 1 : vector<8x256xf32>, i32 -> vector<8x256xf32>
    %23 = arith.maximumf %17, %22 : vector<8x256xf32>
    %24 = arith.minimumf %17, %22 : vector<8x256xf32>
    %25 = arith.maximumf %24, %21 : vector<8x256xf32>
    %c8_i32 = arith.constant 8 : i32
    %26 = tpu.dynamic_rotate %25 by %c8_i32 dim 1 : vector<8x256xf32>, i32 -> vector<8x256xf32>
    %27 = arith.maximumf %25, %26 : vector<8x256xf32>
    %c8_i32_5 = arith.constant 8 : i32
    %28 = tpu.dynamic_rotate %23 by %c8_i32_5 dim 1 : vector<8x256xf32>, i32 -> vector<8x256xf32>
    %29 = arith.maximumf %23, %28 : vector<8x256xf32>
    %30 = arith.minimumf %23, %28 : vector<8x256xf32>
    %31 = arith.maximumf %30, %27 : vector<8x256xf32>
    %32 = tpu.iota {dimensions = array<i32: 1>} : vector<1x256xi32>
    %c15_i32 = arith.constant 15 : i32
    %33 = vector.broadcast %c15_i32 : i32 to vector<1x256xi32>
    %34 = arith.andi %32, %33 : vector<1x256xi32>
    %c15_i32_6 = arith.constant 15 : i32
    %35 = vector.broadcast %c15_i32_6 : i32 to vector<1x256xi32>
    %36 = arith.cmpi eq, %34, %35 : vector<1x256xi32>
    %cst_7 = arith.constant 0.000000e+00 : f32
    %37 = vector.broadcast %cst_7 : f32 to vector<8x256xf32>
    %38 = arith.cmpf ogt, %29, %37 : vector<8x256xf32>
    %39 = vector.broadcast %36 : vector<1x256xi1> to vector<8x256xi1>
    %40 = arith.andi %39, %38 : vector<8x256xi1>
    %41 = arith.addf %29, %31 : vector<8x256xf32>
    %cst_8 = arith.constant 0.000000e+00 : f32
    %42 = vector.broadcast %cst_8 : f32 to vector<8x256xf32>
    %43 = arith.select %40, %41, %42 : vector<8x256xi1>, vector<8x256xf32>
    %44 = vector.shape_cast %43 : vector<8x256xf32> to vector<1x8x256xf32>
    %cst_9 = arith.constant dense<0.000000e+00> : vector<8x256xf32>
    %45 = vector.multi_reduction <add>, %44, %cst_9 [0] : vector<1x8x256xf32> to vector<8x256xf32>
    %46 = arith.subf %10, %45 : vector<8x256xf32>
    %c0_10 = arith.constant 0 : index
    %c0_11 = arith.constant 0 : index
    %47 = vector.load %arg2[%c0_10, %c0_11] : memref<8x256xf32, #tpu.memory_space<vmem>>, vector<8x256xf32>
    tpu.vector_store %arg2[%c0_10, %c0_11], %46 {strides = array<i32>} : memref<8x256xf32, #tpu.memory_space<vmem>>, vector<8x256xf32>,
    return
  }
  func.func @transform_0(%arg0: i32) -> (i32, i32) {
    %c0_i32 = arith.constant 0 : i32
    %c0_i32_0 = arith.constant 0 : i32
    return %arg0, %c0_i32 : i32, i32
  }
  func.func @transform_1(%arg0: i32) -> (i32, i32) {
    %c0_i32 = arith.constant 0 : i32
    %c0_i32_0 = arith.constant 0 : i32
    return %arg0, %c0_i32 : i32, i32
  }
}

</mosaic_0001>

<bundles_post_ra>
// kernel: tpu_custom_call.1
= control target key start
LH: loop header
LB: loop body
LE: loop exit
PB: predicated region body
PF: predicated region fallthrough
CT: control target
= control target key end

     0   :  { %6 = vsyncpa [#allocation3], 0  ;;  %s313_s0 = inlined_call_operand.hbm [shape: f32[8,256], index: 0, kind: input, shape index: {}]   ;;  %s314_s1 = inlined_call_operand.hbm [shape: f32[8,256], index: 1, kind: output, shape index: {}]  }
   0x1   :  { %7 = vsyncpa [#allocation4], 0  ;;  %s231_s6 = smov [#allocation2]   ;;  %s183_s10 = scalar_lea.hbm %s313_s0, 256 }
   0x2   :  { %s14_s7 = sshll.u32 %s231_s6, 4  ;;  %p184_p0 = scmp.ne.s32.totalorder %s313_s0, %s183_s10  ;;  %s15_s7 = int_to_ptr.vmem [resolvable:$true] %s14_s7 }
   0x3   :  { %p187_p1 = scmp.lt.u32.totalorder %s183_s10, %s313_s0 }
   0x5   :  { %p189_p2 = pnand %p187_p1, %p184_p0 }
   0x7   :  { %192 = shalt.err (!%p189_p2)
}
   0x8   :  { %s193_s15 = scalar_lea.vmem %s15_s7, 256  ;;  %p198_p4 = scmp.lt.s32.totalorder %s15_s7, %s15_s7 }
   0x9   :  { %p194_p3 = scmp.ne.s32.totalorder %s15_s7, %s193_s15  ;;  %p199_p5 = scmp.lt.s32.totalorder %s193_s15, %s193_s15 }
   0xb   :  { %p200_p6 = por %p199_p5, %p198_p4 }
   0xd   :  { %p201_p7 = pnand %p200_p6, %p194_p3 }
   0xf   :  { %204 = shalt.err (!%p201_p7)
}
  0x10   :  { %17 = dma.hbm_to_vmem [thread:$0]  %s313_s0, 256, %s15_s7, [#allocation3]  }
  0x11   :  { %227 = dma.done.wait [#allocation3], 256  }
  0x12   :  { %228 = vsyncadd [#allocation3], 4294967040  ;;  %v259_v0 = vld [vmem:[#allocation2] sm:$0xff]  ;;  %s232_s18 = smov 1   ;;  %v262_v1 = vld [vmem:[#allocation2 + $0x8] sm:$0xff]  ;;  %v59_v2 = vlaneseq  ;;  %s233_s0 = smov 2  }
  0x13   :  { %55 = vrot.lane.b32.xlu0 %v259_v0, %s232_s18  ;;  %s234_s19 = smov 4   ;;  %s235_s20 = smov 8   ;;  %v25_v44 = vand.u32 2147483647, %v259_v0  ;;  %v26_v45 = vand.u32 2147483647, %v262_v1 }
  0x14   :  { %v265_v3 = vand.u32 127, %v59_v2  ;;  %s236_s21 = smov [#allocation5]  }
  0x15   :  { %v27_v46 = vsub.f32 0.0, %v25_v44  ;;  %v28_v47 = vsub.f32 0.0, %v26_v45  ;;  %s160_s22 = sshll.u32 %s236_s21, 4  ;;  %s161_s22 = int_to_ptr.vmem [resolvable:$true] %s160_s22 }
  0x16   :  { %vm61_vm0 = vcmp.lt.s32.totalorder %v265_v3, 1  ;;  %vm72_vm1 = vcmp.lt.s32.totalorder %v265_v3, 2  ;;  %vm93_vm2 = vcmp.lt.s32.totalorder %v265_v3, 4  ;;  %vm114_vm3 = vcmp.lt.s32.totalorder %v265_v3, 8  ;;  %s205_s23 = scalar_lea.vmem %s161_s22, 256  ;;  %p210_p9 = scmp.lt.s32.totalorder %s161_s22, %s161_s22 }
  0x17   :  { %57 = vrot.lane.b32.xlu0 %v262_v1, %s232_s18  ;;  %v29_v48 = vmul.f32 1.442695, %v27_v46  ;;  %v31_v49 = vmul.f32 1.442695, %v28_v47  ;;  %v131_v62 = vadd.s32 128, %v265_v3  ;;  %p206_p8 = scmp.ne.s32.totalorder %s161_s22, %s205_s23  ;;  %p211_p10 = scmp.lt.s32.totalorder %s205_s23, %s205_s23 }
  0x19   :  { %175 = vpow2.f32 %v29_v48  ;;  %p212_p11 = por %p211_p10, %p210_p9 }
  0x1a   :  { %177 = vpow2.f32 %v31_v49 }
  0x1b   :  { %p213_p12 = pnand %p212_p11, %p206_p8 }
  0x23   :  { %v176_v50 = vpop.eup %175 }
  0x24   :  { %v178_v51 = vpop.eup %177  ;;  %v33_v52 = vadd.f32 1.0, %v176_v50  ;;  %v36_v54 = vmul.f32 -0.5, %v176_v50  ;;  %v39_v60 = vand.u32 2147483647, %v176_v50 }
  0x25   :  { %v42_v53 = vadd.f32 1.0, %v178_v51  ;;  %v45_v55 = vmul.f32 -0.5, %v178_v51  ;;  %v48_v61 = vand.u32 2147483647, %v178_v51 }
  0x26   :  { %179 = vlog2.f32 %v33_v52  ;;  %v37_v57 = vadd.f32 1.0, %v36_v54  ;;  %vm278_vm4 = vcmp.lt.f32.partialorder %v39_v60, 0.0004427343 }
  0x27   :  { %181 = vlog2.f32 %v42_v53  ;;  %v46_v58 = vadd.f32 1.0, %v45_v55  ;;  %vm282_vm5 = vcmp.lt.f32.partialorder %v48_v61, 0.0004427343 }
  0x30   :  { %v180_v56 = vpop.eup %179 }
  0x31   :  { %v182_v59 = vpop.eup %181 }
  0x85   :  { %v56_v4 = vpop.permute.xlu0 %55 }
  0x89   :  { %v58_v5 = vpop.permute.xlu0 %57 }
  0x8a   :  { %v63_v6 = vsel %vm61_vm0, %v58_v5, %v56_v4  ;;  %v62_v9 = vsel %vm61_vm0, %v56_v4, %v58_v5  ;;  %v35_v4 = vmul.f32 0.6931472, %v180_v56  ;;  %v38_v5 = vmul.f32 %v176_v50, %v37_v57 }
  0x8b   :  { %v64_v7 = vmax.f32 %v259_v0, %v63_v6  ;;  %v66_v8 = vmin.f32 %v259_v0, %v63_v6  ;;  %v67_v10 = vmin.f32 %v262_v1, %v62_v9  ;;  %v65_v11 = vmax.f32 %v262_v1, %v62_v9 }
  0x8c   :  { %v44_v6 = vmul.f32 0.6931472, %v182_v59 }
  0x8d   :  { %68 = vrot.lane.b32.xlu1 %v66_v8, %s233_s0  ;;  %77 = vrot.lane.b32.xlu0 %v64_v7, %s233_s0 }
  0x91   :  { %70 = vrot.lane.b32.xlu1 %v67_v10, %s233_s0 }
  0x95   :  { %79 = vrot.lane.b32.xlu1 %v65_v11, %s233_s0 }
  0xff   :  { %v69_v12 = vpop.permute.xlu1 %68  ;;  %v78_v16 = vpop.permute.xlu0 %77 }
 0x103   :  { %v71_v13 = vpop.permute.xlu1 %70 }
 0x104   :  { %v73_v14 = vsel %vm72_vm1, %v69_v12, %v71_v13  ;;  %v74_v15 = vsel %vm72_vm1, %v71_v13, %v69_v12  ;;  %v132_v12 = vand.u32 15, %v265_v3  ;;  %v133_v13 = vand.u32 15, %v131_v62 }
 0x105   :  { %v75_v20 = vmax.f32 %v66_v8, %v74_v15  ;;  %v76_v21 = vmax.f32 %v67_v10, %v73_v14 }
 0x106   :  { %vm134_vm6 = vcmp.eq.s32.totalorder %v132_v12, 15  ;;  %vm135_vm7 = vcmp.eq.s32.totalorder %v133_v13, 15 }
 0x107   :  { %v80_v17 = vpop.permute.xlu1 %79 }
 0x108   :  { %v81_v18 = vsel %vm72_vm1, %v78_v16, %v80_v17  ;;  %v82_v19 = vsel %vm72_vm1, %v80_v17, %v78_v16  ;;  %v23_v16 = vmax.f32 %v259_v0, 0.0  ;;  %v24_v17 = vmax.f32 %v262_v1, 0.0 }
 0x109   :  { %v85_v22 = vmin.f32 %v64_v7, %v82_v19  ;;  %v86_v23 = vmin.f32 %v65_v11, %v81_v18  ;;  %v83_v26 = vmax.f32 %v64_v7, %v82_v19  ;;  %v84_v27 = vmax.f32 %v65_v11, %v81_v18 }
 0x10a   :  { %v47_v7 = vmul.f32 %v178_v51, %v46_v58  ;;  %v41_v18 = vsel %vm278_vm4, %v38_v5, %v35_v4 }
 0x10b   :  { %v87_v24 = vmax.f32 %v85_v22, %v75_v20  ;;  %v88_v25 = vmax.f32 %v86_v23, %v76_v21 }
 0x10c   :  { %v50_v19 = vsel %vm282_vm5, %v47_v7, %v44_v6 }
 0x10d   :  { %89 = vrot.lane.b32.xlu0 %v87_v24, %s234_s19  ;;  %91 = vrot.lane.b32.xlu1 %v88_v25, %s234_s19 }
 0x111   :  { %98 = vrot.lane.b32.xlu0 %v83_v26, %s234_s19  ;;  %100 = vrot.lane.b32.xlu1 %v84_v27, %s234_s19 }
 0x17f   :  { %v90_v28 = vpop.permute.xlu0 %89  ;;  %v92_v29 = vpop.permute.xlu1 %91 }
 0x180   :  { %v94_v30 = vsel %vm93_vm2, %v90_v28, %v92_v29  ;;  %v95_v31 = vsel %vm93_vm2, %v92_v29, %v90_v28  ;;  %v51_v28 = vadd.f32 %v41_v18, %v23_v16  ;;  %v52_v29 = vadd.f32 %v50_v19, %v24_v17 }
 0x181   :  { %v96_v36 = vmax.f32 %v87_v24, %v95_v31  ;;  %v97_v37 = vmax.f32 %v88_v25, %v94_v30 }
 0x183   :  { %v99_v32 = vpop.permute.xlu0 %98  ;;  %v101_v33 = vpop.permute.xlu1 %100 }
 0x184   :  { %v102_v34 = vsel %vm93_vm2, %v99_v32, %v101_v33  ;;  %v103_v35 = vsel %vm93_vm2, %v101_v33, %v99_v32 }
 0x185   :  { %v106_v38 = vmin.f32 %v83_v26, %v103_v35  ;;  %v107_v39 = vmin.f32 %v84_v27, %v102_v34  ;;  %v104_v42 = vmax.f32 %v83_v26, %v103_v35  ;;  %v105_v43 = vmax.f32 %v84_v27, %v102_v34 }
 0x187   :  { %v108_v40 = vmax.f32 %v106_v38, %v96_v36  ;;  %v109_v41 = vmax.f32 %v107_v39, %v97_v37 }
 0x189   :  { %110 = vrot.lane.b32.xlu0 %v108_v40, %s235_s20  ;;  %112 = vrot.lane.b32.xlu1 %v109_v41, %s235_s20 }
 0x18d   :  { %119 = vrot.lane.b32.xlu0 %v104_v42, %s235_s20  ;;  %121 = vrot.lane.b32.xlu1 %v105_v43, %s235_s20 }
 0x1fb   :  { %v111_v63 = vpop.permute.xlu0 %110  ;;  %v113_v2 = vpop.permute.xlu1 %112 }
 0x1fc   :  { %v115_v10 = vsel %vm114_vm3, %v111_v63, %v113_v2  ;;  %v116_v11 = vsel %vm114_vm3, %v113_v2, %v111_v63 }
 0x1fd   :  { %v117_v20 = vmax.f32 %v108_v40, %v116_v11  ;;  %v118_v21 = vmax.f32 %v109_v41, %v115_v10 }
 0x1ff   :  { %v120_v14 = vpop.permute.xlu0 %119  ;;  %v122_v15 = vpop.permute.xlu1 %121 }
 0x200   :  { %v123_v22 = vsel %vm114_vm3, %v120_v14, %v122_v15  ;;  %v124_v23 = vsel %vm114_vm3, %v122_v15, %v120_v14 }
 0x201   :  { %v125_v24 = vmax.f32 %v104_v42, %v124_v23  ;;  %v126_v25 = vmax.f32 %v105_v43, %v123_v22  ;;  %v127_v26 = vmin.f32 %v104_v42, %v124_v23  ;;  %v128_v0 = vmin.f32 %v105_v43, %v123_v22 }
 0x203   :  { %v129_v1 = vmax.f32 %v127_v26, %v117_v20  ;;  %v130_v27 = vmax.f32 %v128_v0, %v118_v21  ;;  %vm136_vm8 = vcmp.gt.f32.partialorder %v125_v24, 0.0  ;;  %vm137_vm9 = vcmp.gt.f32.partialorder %v126_v25, 0.0 }
 0x204   :  { %vm142_vm10 = vmand %vm134_vm6, %vm136_vm8 }
 0x205   :  { %v144_v30 = vadd.f32 %v129_v1, %v125_v24  ;;  %v145_v31 = vadd.f32 %v130_v27, %v126_v25  ;;  %vm143_vm11 = vmand %vm135_vm7, %vm137_vm9 }
 0x207   :  { %v146_v3 = vsel %vm142_vm10, %v144_v30, 0.0  ;;  %v147_v32 = vsel %vm143_vm11, %v145_v31, 0.0 }
 0x208   :  { %v150_v33 = vsub.f32 %v51_v28, %v146_v3  ;;  %v151_v34 = vsub.f32 %v52_v29, %v147_v32 }
 0x20a   :  { %152 = vst [vmem:[#allocation5] sm:$0xff] %v150_v33  ;;  %153 = vst [vmem:[#allocation5 + $0x8] sm:$0xff] %v151_v34 }
 0x20b   :  { %216 = shalt.err (!%p213_p12)
}
 0x20c   :  { %s217_s26 = scalar_lea.hbm %s314_s1, 256 }
 0x20d   :  { %p218_p13 = scmp.ne.s32.totalorder %s314_s1, %s217_s26  ;;  %p221_p0 = scmp.lt.u32.totalorder %s217_s26, %s314_s1 }
 0x20f   :  { %p223_p1 = pnand %p221_p0, %p218_p13 }
 0x211   :  { %226 = shalt.err (!%p223_p1)
}
 0x212   :  { %163 = dma.vmem_to_hbm [thread:$0]  %s161_s22, 256, %s314_s1, [#allocation4]  }
 0x213   :  { %229 = dma.done.wait [#allocation4], 256  }
 0x214   :  { %230 = vsyncadd [#allocation4], 4294967040 }
 0x215   :  { %167 = vsyncpa [#allocation3], 1 }
 0x216   :  { %168 = vsyncpa [#allocation4], 1 }

</bundles_post_ra>
